<compile_context>
chip_gen: v7x
topology: tpu7x:2x2x1
jax: 0.10.0
libtpu: 0.0.40
codegen_flags: <defaults>
</compile_context>

<pallas_src>
import jax
import jax.numpy as jnp
from jax.experimental import pallas as pl
from jax.experimental.pallas import tpu as pltpu


def _poly_ode3_kernel(a_ref, zt_ref, ot_ref):
    """VPU-only tile body.

    a_ref  : (4,) f32 in SMEM  -> [a00, a01, a10, a11]
    zt_ref : (2, tn) tile of z^T in VMEM (state dim on sublanes, batch on lanes)
    ot_ref : (2, tn) tile of out^T in VMEM
    """
    z = zt_ref[...].astype(jnp.float32)   # (2, tn)
    z3 = z * z * z                        # elementwise cube (VPU)
    z3_0 = z3[0:1, :]                     # (1, tn) == (z[:, 0] ** 3)^T
    z3_1 = z3[1:2, :]                     # (1, tn) == (z[:, 1] ** 3)^T

    a00 = a_ref[0]
    a01 = a_ref[1]
    a10 = a_ref[2]
    a11 = a_ref[3]

    # Each output row is written exactly once.
    ot_ref[0:1, :] = (a00 * z3_0 + a10 * z3_1).astype(ot_ref.dtype)  # out[:, 0]^T
    ot_ref[1:2, :] = (a01 * z3_0 + a11 * z3_1).astype(ot_ref.dtype)  # out[:, 1]^T


def poly_ode3_forward(t, z, true_A, *, block_n=128 * 1024):
    """JAX/Pallas equivalent of PolyOde3.forward(t, z) = (z ** 3) @ true_A.

    `t` is unused (kept to mirror the PyTorch signature).
    """
    del t
    N, D = z.shape
    assert D == 2 and true_A.shape == (D, D)

    # Lane-dense layout: [2, N] with the batch axis on the lane axis.
    zT = jnp.transpose(z)  # (2, N)

    # Tile size along N: a multiple of 128, capped by block_n; pad N up to it.
    tn = min(block_n, max(128, pl.cdiv(N, 128) * 128))
    n_pad = pl.cdiv(N, tn) * tn
    if n_pad != N:
        zT = jnp.pad(zT, ((0, 0), (0, n_pad - N)))

    # Flat [a00, a01, a10, a11]; lives in SMEM inside the kernel.
    a_flat = jnp.reshape(true_A, (4,)).astype(jnp.float32)

    outT = pl.pallas_call(
        _poly_ode3_kernel,
        out_shape=jax.ShapeDtypeStruct((2, n_pad), z.dtype),
        grid=(n_pad // tn,),
        in_specs=[
            pl.BlockSpec(memory_space=pltpu.MemorySpace.SMEM),  # true_A scalars
            pl.BlockSpec((2, tn), lambda i: (0, i)),            # z^T tile
        ],
        out_specs=pl.BlockSpec((2, tn), lambda i: (0, i)),
        compiler_params=pltpu.CompilerParams(
            dimension_semantics=("parallel",),
        ),
    )(a_flat, zT)

    return jnp.transpose(outT[:, :N])  # back to [N, 2]


if __name__ == "__main__":
    # Deterministic parameter init (matches the module's __init__).
    true_A = jnp.array([[-0.1, 2.0], [-2.0, -0.1]], dtype=jnp.float32)
    t = jnp.float32(0.0)  # unused, mirrors the PyTorch signature

    key0, key1 = jax.random.split(jax.random.PRNGKey(0))

    # Small example consistent with the module: batch of 8 two-dimensional states.
    z = jax.random.normal(key0, (8, 2), dtype=jnp.float32)
    out = jax.block_until_ready(poly_ode3_forward(t, z, true_A))
    ref = jnp.dot(z ** 3, true_A)
    assert out.shape == (8, 2)
    assert jnp.allclose(out, ref, atol=1e-5, rtol=1e-5)

    # Non-multiple-of-128 batch to exercise the padding / tiling path.
    z_big = jax.random.normal(key1, (300, 2), dtype=jnp.float32)
    out_big = jax.block_until_ready(poly_ode3_forward(t, z_big, true_A))
    ref_big = jnp.dot(z_big ** 3, true_A)
    assert out_big.shape == (300, 2)
    assert jnp.allclose(out_big, ref_big, atol=1e-5, rtol=1e-5)

    print("KERNEL_OK")
</pallas_src>

<mosaic_0001>
module attributes {stable_mosaic.version = 11 : i64} {
  func.func @_poly_ode3_kernel(%arg0: i32, %arg1: memref<4xf32, #tpu.memory_space<smem>>, %arg2: memref<2x128xf32, #tpu.memory_space<vmem>>, %arg3: memref<2x128xf32, #tpu.memory_space<vmem>>) attributes {dimension_semantics = [#tpu.dimension_semantics<parallel>], iteration_bounds = array<i64: 1>, scalar_prefetch = 0 : i64, scratch_operands = 0 : i64, tpu.core_type = #tpu.core_type<tc>, window_params = [{transform_indices = @transform_0, window_bounds = array<i64: 4>}, {transform_indices = @transform_1, window_bounds = array<i64: 2, 128>}, {transform_indices = @transform_2, window_bounds = array<i64: 2, 128>}]} {
    %c0 = arith.constant 0 : index
    %c0_0 = arith.constant 0 : index
    %0 = vector.load %arg2[%c0, %c0_0] : memref<2x128xf32, #tpu.memory_space<vmem>>, vector<2x128xf32>
    %1 = arith.mulf %0, %0 : vector<2x128xf32>
    %2 = arith.mulf %1, %0 : vector<2x128xf32>
    %3 = vector.extract_strided_slice %2 {offsets = [0, 0], sizes = [1, 128], strides = [1, 1]} : vector<2x128xf32> to vector<1x128xf32>
    %4 = vector.extract_strided_slice %2 {offsets = [1, 0], sizes = [1, 128], strides = [1, 1]} : vector<2x128xf32> to vector<1x128xf32>
    %c0_1 = arith.constant 0 : index
    %5 = memref.load %arg1[%c0_1] : memref<4xf32, #tpu.memory_space<smem>>
    %c1 = arith.constant 1 : index
    %6 = memref.load %arg1[%c1] : memref<4xf32, #tpu.memory_space<smem>>
    %c2 = arith.constant 2 : index
    %7 = memref.load %arg1[%c2] : memref<4xf32, #tpu.memory_space<smem>>
    %c3 = arith.constant 3 : index
    %8 = memref.load %arg1[%c3] : memref<4xf32, #tpu.memory_space<smem>>
    %9 = vector.broadcast %5 : f32 to vector<1x128xf32>
    %10 = arith.mulf %9, %3 : vector<1x128xf32>
    %11 = vector.broadcast %7 : f32 to vector<1x128xf32>
    %12 = arith.mulf %11, %4 : vector<1x128xf32>
    %13 = arith.addf %10, %12 : vector<1x128xf32>
    %c0_2 = arith.constant 0 : index
    %c0_3 = arith.constant 0 : index
    %14 = vector.load %arg3[%c0_2, %c0_3] : memref<2x128xf32, #tpu.memory_space<vmem>>, vector<1x128xf32>
    tpu.vector_store %arg3[%c0_2, %c0_3], %13 {strides = array<i32>} : memref<2x128xf32, #tpu.memory_space<vmem>>, vector<1x128xf32>,
    %15 = vector.broadcast %6 : f32 to vector<1x128xf32>
    %16 = arith.mulf %15, %3 : vector<1x128xf32>
    %17 = vector.broadcast %8 : f32 to vector<1x128xf32>
    %18 = arith.mulf %17, %4 : vector<1x128xf32>
    %19 = arith.addf %16, %18 : vector<1x128xf32>
    %c1_4 = arith.constant 1 : index
    %c0_5 = arith.constant 0 : index
    %20 = vector.load %arg3[%c1_4, %c0_5] : memref<2x128xf32, #tpu.memory_space<vmem>>, vector<1x128xf32>
    tpu.vector_store %arg3[%c1_4, %c0_5], %19 {strides = array<i32>} : memref<2x128xf32, #tpu.memory_space<vmem>>, vector<1x128xf32>,
    return
  }
  func.func @transform_0(%arg0: i32) -> i32 {
    %c0_i32 = arith.constant 0 : i32
    %c0_i32_0 = arith.constant 0 : i32
    return %c0_i32 : i32
  }
  func.func @transform_1(%arg0: i32) -> (i32, i32) {
    %c0_i32 = arith.constant 0 : i32
    %c0_i32_0 = arith.constant 0 : i32
    return %c0_i32, %arg0 : i32, i32
  }
  func.func @transform_2(%arg0: i32) -> (i32, i32) {
    %c0_i32 = arith.constant 0 : i32
    %c0_i32_0 = arith.constant 0 : i32
    return %c0_i32, %arg0 : i32, i32
  }
}

</mosaic_0001>

<bundles_post_ra>
// kernel: tpu_custom_call.1
= control target key start
LH: loop header
LB: loop body
LE: loop exit
PB: predicated region body
PF: predicated region fallthrough
CT: control target
= control target key end

     0   :  { %7 = vsyncpa [#allocation4], 0  ;;  %s148_s0 = inlined_call_operand.hbm [shape: f32[4], index: 0, kind: input, shape index: {}]   ;;  %s149_s1 = inlined_call_operand.vmem [shape: f32[2,128], index: 1, kind: input, shape index: {}]   ;;  %s150_s2 = inlined_call_operand.hbm [shape: f32[2,128], index: 2, kind: output, shape index: {}]  }
   0x1   :  { %8 = vsyncpa [#allocation3], 0  ;;  %s68_s11 = scalar_lea.hbm %s148_s0, 16 }
   0x2   :  { %p69_p0 = scmp.ne.s32.totalorder %s148_s0, %s68_s11  ;;  %p72_p1 = scmp.lt.u32.totalorder %s68_s11, %s148_s0 }
   0x4   :  { %p74_p2 = pnand %p72_p1, %p69_p0 }
   0x6   :  { %77 = shalt.err (!%p74_p2)
}
   0x7   :  { %s104_s16 = smov [#allocation2]  }
   0x8   :  { %16 = dma.hbm_to_smem %s148_s0, 16, %s104_s16, [#allocation4]  }
   0x9   :  { %100 = dma.done.wait [#allocation4], 16  }
   0xa   :  { %101 = vsyncadd [#allocation4], 4294967280 }
   0xb   :  { %22 = sfence }
   0xc   :  { %v23_v0 = vld [vmem:[%s149_s1] sm:$0x3]  ;;  %s26_s21 = sld [smem:[#allocation2]]  ;;  %s64_s22 = sld [smem:[#allocation2 + $0x2]] }
   0xd   :  { %v24_v1 = vmul.f32 %v23_v0, %v23_v0  ;;  %s63_s23 = sld [smem:[#allocation2 + $0x1]]  ;;  %s65_s24 = sld [smem:[#allocation2 + $0x3]] }
   0xe   :  { %s105_s0 = smov [#allocation5]  }
   0xf   :  { %v25_v2 = vmul.f32 %v24_v1, %v23_v0  ;;  %s54_s25 = sshll.u32 %s105_s0, 4  ;;  %s55_s25 = int_to_ptr.vmem [resolvable:$true] %s54_s25 }
  0x10   :  { %s78_s1 = scalar_lea.vmem %s55_s25, 32  ;;  %p83_p4 = scmp.lt.s32.totalorder %s55_s25, %s55_s25 }
  0x11   :  { %p79_p3 = scmp.ne.s32.totalorder %s55_s25, %s78_s1  ;;  %p84_p5 = scmp.lt.s32.totalorder %s78_s1, %s78_s1 }
  0x12   :  { %v30_v3 = vstv %s26_s21  ;;  %v32_v4 = vstv %s64_s22 }
  0x13   :  { %v31_v5 = vmul.f32 %v30_v3, %v25_v2  ;;  %v33_v6 = vmul.f32 %v32_v4, %v25_v2  ;;  %v39_v7 = vstv %s63_s23  ;;  %v41_v8 = vstv %s65_s24  ;;  %p85_p6 = por %p84_p5, %p83_p4 }
  0x14   :  { %v40_v9 = vmul.f32 %v39_v7, %v25_v2  ;;  %v42_v10 = vmul.f32 %v41_v8, %v25_v2 }
  0x15   :  { %v35_v11 = vrot.slane %v33_v6, 1  ;;  %p86_p7 = pnand %p85_p6, %p79_p3 }
  0x16   :  { %v44_v12 = vrot.slane %v42_v10, 1 }
  0x17   :  { %v37_v13 = vadd.f32 %v35_v11, %v31_v5 }
  0x18   :  { %v46_v14 = vadd.f32 %v44_v12, %v40_v9 }
  0x19   :  { %38 = vst [vmem:[#allocation5] sm:$0x1] %v37_v13 }
  0x1a   :  { %47 = vst [vmem:[#allocation5 + $0x1] sm:$0x1] %v46_v14 }
  0x1b   :  { %89 = shalt.err (!%p86_p7)
}
  0x1c   :  { %s90_s28 = scalar_lea.hbm %s150_s2, 32 }
  0x1d   :  { %p91_p8 = scmp.ne.s32.totalorder %s150_s2, %s90_s28  ;;  %p94_p9 = scmp.lt.u32.totalorder %s90_s28, %s150_s2 }
  0x1f   :  { %p96_p10 = pnand %p94_p9, %p91_p8 }
  0x21   :  { %99 = shalt.err (!%p96_p10)
}
  0x22   :  { %57 = dma.vmem_to_hbm [thread:$0]  %s55_s25, 32, %s150_s2, [#allocation3]  }
  0x23   :  { %102 = dma.done.wait [#allocation3], 32  }
  0x24   :  { %103 = vsyncadd [#allocation3], 4294967264 }
  0x25   :  { %61 = vsyncpa [#allocation3], 1 }
  0x26   :  { %62 = vsyncpa [#allocation4], 1 }

</bundles_post_ra>
